<compile_context>
chip_gen: v7x
topology: tpu7x:2x2x1
jax: 0.10.0
libtpu: 0.0.40
codegen_flags: <defaults>
</compile_context>

<pallas_src>
import jax
import jax.numpy as jnp
from jax.experimental import pallas as pl
from jax.experimental.pallas import tpu as pltpu


def _round_up(n, m):
    return ((n + m - 1) // m) * m


def _cdiv(a, b):
    return -(-a // b)


def _choose_tile(batch, tb_max):
    """Pick the batch tile: as large as possible (<= tb_max), lane-aligned
    (multiple of 128), and -- when more than one tile is needed -- prefer an
    EVEN tile count so the single 'parallel' grid axis splits evenly across
    v7x's two TensorCores."""
    tb_max = max(128, _round_up(int(tb_max), 128))
    tb = min(tb_max, _round_up(batch, 128))
    n = _cdiv(batch, tb)
    if n > 1 and n % 2 == 1:
        tb_try = _round_up(_cdiv(batch, n + 1), 128)
        if tb_try >= 128 and _cdiv(batch, tb_try) % 2 == 0:
            tb, n = tb_try, _cdiv(batch, tb_try)
    return tb, n


def mlp_kernel(x_ref, w1_ref, b1_ref, w2_ref, b2_ref, w3_ref, b3_ref, o_ref):
    # x_ref: (2, TB)   activations, batch on lanes
    x = x_ref[...]

    # ---- Layer 1: 2 -> 32 on the MXU (K=2 is padded internally by Mosaic).
    # Only the bias-add + ReLU remain on the VPU.
    h1 = jnp.dot(w1_ref[...], x, preferred_element_type=jnp.float32)    # (32, TB)
    h1 = jnp.maximum(h1 + b1_ref[...], 0.0)                             # bias (32,1) bcast

    # ---- Layer 2: 32 -> 16 on the MXU, f32 accumulation.
    h2 = jnp.dot(w2_ref[...], h1, preferred_element_type=jnp.float32)   # (16, TB)
    h2 = jnp.maximum(h2 + b2_ref[...], 0.0)                             # bias (16,1) bcast

    # ---- Layer 3: 16 -> 1 as a (1,16)@(16,TB) MXU dot (replaces the old
    # 16-vreg VPU multiply + XLU cross-sublane reduce).
    out = jnp.dot(w3_ref[...], h2, preferred_element_type=jnp.float32)  # (1, TB)
    o_ref[...] = (out + b3_ref[0]).astype(o_ref.dtype)                  # scalar bias (SMEM)


def mlp_forward(x, params, *, tb=16384):
    """x: (B, 2) float32.  Returns (B, 1) float32."""
    B, F = x.shape
    assert F == 2, "MLP expects 2 input features"

    tb_eff, n_tiles = _choose_tile(B, tb)

    # Single XLA copy to feature-major / batch-on-lanes.  No explicit zero-pad:
    # the ragged tail tile uses Pallas edge-block semantics (masked writeback).
    # TODO(synk): producers that can hand over feature-major (2, B) data
    # directly would skip this transpose entirely.
    x_t = x.astype(jnp.float32).T                       # (2, B)

    w1, b1 = params["w1"], params["b1"]                 # (32, 2), (32, 1)
    w2, b2 = params["w2"], params["b2"]                 # (16, 32), (16, 1)
    w3, b3 = params["w3"], params["b3"]                 # (1, 16),  (1,)

    in_specs = [
        pl.BlockSpec((2, tb_eff), lambda i: (0, i)),    # x tile (lane-dense)
        pl.BlockSpec((32, 2), lambda i: (0, 0)),        # w1
        pl.BlockSpec((32, 1), lambda i: (0, 0)),        # b1
        pl.BlockSpec((16, 32), lambda i: (0, 0)),       # w2
        pl.BlockSpec((16, 1), lambda i: (0, 0)),        # b2
        pl.BlockSpec((1, 16), lambda i: (0, 0)),        # w3 row
        pl.BlockSpec(memory_space=pltpu.MemorySpace.SMEM),  # b3 scalar
    ]
    out_spec = pl.BlockSpec((1, tb_eff), lambda i: (0, i))

    out_t = pl.pallas_call(
        mlp_kernel,
        out_shape=jax.ShapeDtypeStruct((1, B), jnp.float32),
        grid=(n_tiles,),
        in_specs=in_specs,
        out_specs=out_spec,
        compiler_params=pltpu.CompilerParams(
            dimension_semantics=("parallel",),
            # Raise v5e's 16 MiB scoped default so big tiles (and tb sweeps up
            # to 32768 on v6e/v7x) fit comfortably; well under v7x's 64 MiB.
            vmem_limit_bytes=32 * 1024 * 1024,
        ),
    )(x_t, w1, b1, w2, b2, w3, b3)

    return out_t.T                                      # (B, 1)


def init_params(key):
    """Deterministic init mirroring torch.nn.Linear's default
    (uniform(-1/sqrt(fan_in), 1/sqrt(fan_in)) for weight and bias).
    Weights stored PyTorch-style (out, in); biases as column vectors."""
    def linear(key, fan_in, fan_out):
        kw, kb = jax.random.split(key)
        bound = 1.0 / jnp.sqrt(float(fan_in))
        w = jax.random.uniform(kw, (fan_out, fan_in), jnp.float32, -bound, bound)
        b = jax.random.uniform(kb, (fan_out, 1), jnp.float32, -bound, bound)
        return w, b

    k1, k2, k3 = jax.random.split(key, 3)
    w1, b1 = linear(k1, 2, 32)                 # (32, 2), (32, 1)
    w2, b2 = linear(k2, 32, 16)                # (16, 32), (16, 1)
    w3, b3 = linear(k3, 16, 1)                 # (1, 16), (1, 1)
    return {
        "w1": w1, "b1": b1,
        "w2": w2, "b2": b2,
        "w3": w3,                              # (1, 16) row for the MXU dot
        "b3": b3.reshape(1),                   # scalar, lives in SMEM
    }


def mlp_reference(x, p):
    h1 = jnp.maximum(x @ p["w1"].T + p["b1"].T, 0.0)
    h2 = jnp.maximum(h1 @ p["w2"].T + p["b2"].T, 0.0)
    return h2 @ p["w3"].T + p["b3"]


if __name__ == "__main__":
    key = jax.random.PRNGKey(0)
    kx, kp = jax.random.split(key)
    params = init_params(kp)

    # Small batch consistent with an MLP over 2-d state inputs (single edge block).
    B = 8
    x = jax.random.normal(kx, (B, 2), jnp.float32)
    out = jax.block_until_ready(mlp_forward(x, params))
    ref = mlp_reference(x, params)
    assert out.shape == (B, 1)
    assert jnp.allclose(out, ref, atol=1e-4, rtol=1e-4)

    # Non-multiple batch: exercises the masked tail block (no wrapper-side pad).
    B2 = 1000
    x2 = jax.random.normal(kx, (B2, 2), jnp.float32)
    out2 = jax.block_until_ready(mlp_forward(x2, params))
    ref2 = mlp_reference(x2, params)
    assert out2.shape == (B2, 1)
    assert jnp.allclose(out2, ref2, atol=1e-4, rtol=1e-4)

    # Forced small tile: exercises the multi-tile path with an even grid
    # (4 tiles of 256 for B=1000) plus a masked tail block.
    out3 = jax.block_until_ready(mlp_forward(x2, params, tb=256))
    assert out3.shape == (B2, 1)
    assert jnp.allclose(out3, ref2, atol=1e-4, rtol=1e-4)

    print("KERNEL_OK")
</pallas_src>

<mosaic_0001>
module attributes {stable_mosaic.version = 11 : i64} {
  func.func @mlp_kernel(%arg0: i32, %arg1: memref<2x128xf32, #tpu.memory_space<vmem>>, %arg2: memref<32x2xf32, #tpu.memory_space<vmem>>, %arg3: memref<32x1xf32, #tpu.memory_space<vmem>>, %arg4: memref<16x32xf32, #tpu.memory_space<vmem>>, %arg5: memref<16x1xf32, #tpu.memory_space<vmem>>, %arg6: memref<1x16xf32, #tpu.memory_space<vmem>>, %arg7: memref<1xf32, #tpu.memory_space<smem>>, %arg8: memref<1x128xf32, #tpu.memory_space<vmem>>) attributes {dimension_semantics = [#tpu.dimension_semantics<parallel>], iteration_bounds = array<i64: 1>, scalar_prefetch = 0 : i64, scratch_operands = 0 : i64, tpu.core_type = #tpu.core_type<tc>, window_params = [{transform_indices = @transform_0, window_bounds = array<i64: 2, 128>}, {pipeline_mode = #tpu.pipeline_mode<synchronous>, transform_indices = @transform_1, window_bounds = array<i64: 32, 2>}, {pipeline_mode = #tpu.pipeline_mode<synchronous>, transform_indices = @transform_2, window_bounds = array<i64: 32, 1>}, {pipeline_mode = #tpu.pipeline_mode<synchronous>, transform_indices = @transform_3, window_bounds = array<i64: 16, 32>}, {pipeline_mode = #tpu.pipeline_mode<synchronous>, transform_indices = @transform_4, window_bounds = array<i64: 16, 1>}, {pipeline_mode = #tpu.pipeline_mode<synchronous>, transform_indices = @transform_5, window_bounds = array<i64: 1, 16>}, {transform_indices = @transform_6, window_bounds = array<i64: 1>}, {transform_indices = @transform_7, window_bounds = array<i64: 1, 128>}]} {
    %c0 = arith.constant 0 : index
    %c0_0 = arith.constant 0 : index
    %0 = vector.load %arg1[%c0, %c0_0] : memref<2x128xf32, #tpu.memory_space<vmem>>, vector<2x128xf32>
    %c0_1 = arith.constant 0 : index
    %c0_2 = arith.constant 0 : index
    %1 = vector.load %arg2[%c0_1, %c0_2] : memref<32x2xf32, #tpu.memory_space<vmem>>, vector<32x2xf32>
    %cst = arith.constant dense<0.000000e+00> : vector<32x128xf32>
    %2 = tpu.matmul %1, %0, %cst {dimension_numbers = #tpu.dot_dimension_numbers<[1], [0], [0], [1], [0, 0, 1, 1], [], []>} : vector<32x2xf32>, vector<2x128xf32>, vector<32x128xf32> -> vector<32x128xf32>
    %c0_3 = arith.constant 0 : index
    %c0_4 = arith.constant 0 : index
    %3 = vector.load %arg3[%c0_3, %c0_4] : memref<32x1xf32, #tpu.memory_space<vmem>>, vector<32x1xf32>
    %4 = vector.broadcast %3 : vector<32x1xf32> to vector<32x128xf32>
    %5 = arith.addf %2, %4 : vector<32x128xf32>
    %cst_5 = arith.constant 0.000000e+00 : f32
    %6 = vector.broadcast %cst_5 : f32 to vector<32x128xf32>
    %7 = arith.maximumf %5, %6 : vector<32x128xf32>
    %c0_6 = arith.constant 0 : index
    %c0_7 = arith.constant 0 : index
    %8 = vector.load %arg4[%c0_6, %c0_7] : memref<16x32xf32, #tpu.memory_space<vmem>>, vector<16x32xf32>
    %cst_8 = arith.constant dense<0.000000e+00> : vector<16x128xf32>
    %9 = tpu.matmul %8, %7, %cst_8 {dimension_numbers = #tpu.dot_dimension_numbers<[1], [0], [0], [1], [0, 0, 1, 1], [], []>} : vector<16x32xf32>, vector<32x128xf32>, vector<16x128xf32> -> vector<16x128xf32>
    %c0_9 = arith.constant 0 : index
    %c0_10 = arith.constant 0 : index
    %10 = vector.load %arg5[%c0_9, %c0_10] : memref<16x1xf32, #tpu.memory_space<vmem>>, vector<16x1xf32>
    %11 = vector.broadcast %10 : vector<16x1xf32> to vector<16x128xf32>
    %12 = arith.addf %9, %11 : vector<16x128xf32>
    %cst_11 = arith.constant 0.000000e+00 : f32
    %13 = vector.broadcast %cst_11 : f32 to vector<16x128xf32>
    %14 = arith.maximumf %12, %13 : vector<16x128xf32>
    %c0_12 = arith.constant 0 : index
    %c0_13 = arith.constant 0 : index
    %15 = vector.load %arg6[%c0_12, %c0_13] : memref<1x16xf32, #tpu.memory_space<vmem>>, vector<1x16xf32>
    %cst_14 = arith.constant dense<0.000000e+00> : vector<1x128xf32>
    %16 = tpu.matmul %15, %14, %cst_14 {dimension_numbers = #tpu.dot_dimension_numbers<[1], [0], [0], [1], [0, 0, 1, 1], [], []>} : vector<1x16xf32>, vector<16x128xf32>, vector<1x128xf32> -> vector<1x128xf32>
    %c0_15 = arith.constant 0 : index
    %17 = memref.load %arg7[%c0_15] : memref<1xf32, #tpu.memory_space<smem>>
    %18 = vector.broadcast %17 : f32 to vector<1x128xf32>
    %19 = arith.addf %16, %18 : vector<1x128xf32>
    %c0_16 = arith.constant 0 : index
    %c0_17 = arith.constant 0 : index
    %20 = vector.load %arg8[%c0_16, %c0_17] : memref<1x128xf32, #tpu.memory_space<vmem>>, vector<1x128xf32>
    tpu.vector_store %arg8[%c0_16, %c0_17], %19 {strides = array<i32>} : memref<1x128xf32, #tpu.memory_space<vmem>>, vector<1x128xf32>,
    return
  }
  func.func @transform_0(%arg0: i32) -> (i32, i32) {
    %c0_i32 = arith.constant 0 : i32
    %c0_i32_0 = arith.constant 0 : i32
    return %c0_i32, %arg0 : i32, i32
  }
  func.func @transform_1(%arg0: i32) -> (i32, i32) {
    %c0_i32 = arith.constant 0 : i32
    %c0_i32_0 = arith.constant 0 : i32
    %c0_i32_1 = arith.constant 0 : i32
    return %c0_i32, %c0_i32_0 : i32, i32
  }
  func.func @transform_2(%arg0: i32) -> (i32, i32) {
    %c0_i32 = arith.constant 0 : i32
    %c0_i32_0 = arith.constant 0 : i32
    %c0_i32_1 = arith.constant 0 : i32
    return %c0_i32, %c0_i32_0 : i32, i32
  }
  func.func @transform_3(%arg0: i32) -> (i32, i32) {
    %c0_i32 = arith.constant 0 : i32
    %c0_i32_0 = arith.constant 0 : i32
    %c0_i32_1 = arith.constant 0 : i32
    return %c0_i32, %c0_i32_0 : i32, i32
  }
  func.func @transform_4(%arg0: i32) -> (i32, i32) {
    %c0_i32 = arith.constant 0 : i32
    %c0_i32_0 = arith.constant 0 : i32
    %c0_i32_1 = arith.constant 0 : i32
    return %c0_i32, %c0_i32_0 : i32, i32
  }
  func.func @transform_5(%arg0: i32) -> (i32, i32) {
    %c0_i32 = arith.constant 0 : i32
    %c0_i32_0 = arith.constant 0 : i32
    %c0_i32_1 = arith.constant 0 : i32
    return %c0_i32, %c0_i32_0 : i32, i32
  }
  func.func @transform_6(%arg0: i32) -> i32 {
    %c0_i32 = arith.constant 0 : i32
    %c0_i32_0 = arith.constant 0 : i32
    return %c0_i32 : i32
  }
  func.func @transform_7(%arg0: i32) -> (i32, i32) {
    %c0_i32 = arith.constant 0 : i32
    %c0_i32_0 = arith.constant 0 : i32
    return %c0_i32, %arg0 : i32, i32
  }
}

</mosaic_0001>

<bundles_post_ra>
// kernel: tpu_custom_call.1
= control target key start
LH: loop header
LB: loop body
LE: loop exit
PB: predicated region body
PF: predicated region fallthrough
CT: control target
= control target key end

     0   :  { %vm70_vm0 = vcmask 1041408   ;;  %vm57_vm1 = vcmask 15360   ;;  %v443_v5 = vmov 0   ;;  %s551_s0 = inlined_call_operand.vmem [shape: f32[2,8], index: 0, kind: input, shape index: {}]   ;;  %s552_s1 = inlined_call_operand.vmem [shape: f32[32,2], index: 1, kind: input, shape index: {}]   ;;  %s553_s2 = inlined_call_operand.vmem [shape: f32[32,1], index: 2, kind: input, shape index: {}]   ;;  %s554_s3 = inlined_call_operand.vmem [shape: f32[16,32], index: 3, kind: input, shape index: {}]   ;;  %s555_s4 = inlined_call_operand.vmem [shape: f32[16,1], index: 4, kind: input, shape index: {}]   ;;  %s556_s5 = inlined_call_operand.vmem [shape: f32[1,16], index: 5, kind: input, shape index: {}]   ;;  %s557_s6 = inlined_call_operand.<no memory space> [shape: f32[1], index: 6, kind: input, shape index: {}]   ;;  %s558_s7 = inlined_call_operand.hbm [shape: f32[1,8], index: 7, kind: output, shape index: {}]  }
   0x1   :  { %v28_v0 = vld [vmem:[%s551_s0] sm:$0x3]  ;;  %v30_v2 = vld [vmem:[%s552_s1 + $0x8] sm:$0xff]  ;;  %v31_v3 = vld [vmem:[%s552_s1 + $0x10] sm:$0xff]  ;;  %417 = vset.pattern.permute.xlu0 %v443_v5 }
   0x2   :  { %v29_v1 = vld [vmem:[%s552_s1] sm:$0xff]  ;;  %375 = vmatprep.subr.msk.mxu0 %vm70_vm0, %v28_v0  ;;  %v35_v6 = vld [vmem:[%s553_s2 + $0x10] sm:$0xff] }
   0x3   :  { %377 = vmatprep.mubr.msk.f32.mxu0 %vm57_vm1, %v29_v1  ;;  %v33_v4 = vld [vmem:[%s553_s2] sm:$0xff]  ;;  %376 = vmatpush3.msk.msra.mxu0 %vm70_vm0, %v28_v0 }
   0x4   :  { %378 = vmatmul.mubr.msk.f32.vlgmr.msra.gmra.mrb[0].mxu0 %vm57_vm1, %v30_v2  ;;  %39 = vperm.xlu0 %417, %v33_v4  }
   0x5   :  { %13 = vsyncpa [#allocation4], 0  ;;  %380 = vmatprep.mubr.msk.f32.mxu0 %vm57_vm1, %v31_v3  ;;  %v32_v7 = vld [vmem:[%s552_s1 + $0x18] sm:$0xff]  ;;  %418 = vset.pattern.permute.xlu1 %v443_v5  ;;  %v34_v8 = vld [vmem:[%s553_s2 + $0x8] sm:$0xff]  ;;  %vm177_vm2 = vcmask 261120   ;;  %v444_v32 = vmov 0.0|0.0   ;;  %v263_v44 = vstv %s557_s6 }
   0x6   :  { %49 = vperm.xlu1 %418, %v35_v6   ;;  %v36_v9 = vld [vmem:[%s553_s2 + $0x18] sm:$0xff]  ;;  %v165_v10 = vld [vmem:[%s555_s4] sm:$0xff]  ;;  %v166_v11 = vld [vmem:[%s555_s4 + $0x8] sm:$0xff]  ;;  %409 = vmatprep.subr.bf16.mxu0 %v444_v32  ;;  %vm445_vm3 = vmmov 0   ;;  %v446_v33 = vmov 0.0   ;;  %vm264_vm4 = vcmask 130048  }
   0x7   :  { %v163_v12 = vld [vmem:[%s554_s3] sm:$0xff]  ;;  %v164_v31 = vld [vmem:[%s554_s3 + $0x8] sm:$0xff]  ;;  %s447_s26 = smov [#allocation3]  }
   0x8   :  { %381 = vmatmul.mubr.msk.f32.gmra.mrb[2].mxu0 %vm57_vm1, %v32_v7  ;;  %44 = vperm.xlu0 %417, %v34_v8   ;;  %v261_v43 = vld [vmem:[%s556_s5] sm:$0x1]  ;;  %s345_s27 = sshll.u32 %s447_s26, 4  ;;  %s346_s27 = int_to_ptr.vmem [resolvable:$true] %s345_s27 }
   0x9   :  { %391 = vmatprep.mubr.msk.f32.mxu1 %vm177_vm2, %v163_v12  ;;  %398 = vmatprep.mubr.msk.f32.mxu0 %vm445_vm3, %v446_v33  ;;  %s419_s28 = scalar_lea.vmem %s346_s27, 16  ;;  %s423_s29 = scalar_lea.vmem %s346_s27, 32 }
   0xa   :  { %54 = vperm.xlu1 %418, %v36_v9   ;;  %p420_p0 = scmp.ne.s32.totalorder %s346_s27, %s419_s28  ;;  %p424_p1 = scmp.lt.s32.totalorder %s346_s27, %s346_s27 }
   0xb   :  { %p425_p2 = scmp.lt.s32.totalorder %s423_s29, %s419_s28 }
   0xc   :  { %169 = vperm.xlu0 %417, %v165_v10  }
   0xd   :  { %p426_p3 = por %p425_p2, %p424_p1 }
   0xe   :  { %174 = vperm.xlu1 %418, %v166_v11  }
   0xf   :  { %p427_p4 = pnand %p426_p3, %p420_p0 }
  0x83   :  { %v40_v13 = vpop.permute.xlu0 %39 }
  0x85   :  { %v50_v14 = vpop.permute.xlu1 %49 }
  0x87   :  { %v45_v15 = vpop.permute.xlu0 %44 }
  0x89   :  { %v55_v21 = vpop.permute.xlu1 %54 }
  0x8b   :  { %v170_v36 = vpop.permute.xlu0 %169 }
  0x8d   :  { %v175_v34 = vpop.permute.xlu1 %174 }
  0xd7   :  { %v379_v16 = vpop.f32.mrb[0].mxu0 }
  0xd8   :  { %v146_v17 = vadd.f32 %v379_v16, %v45_v15  ;;  %v140_v18 = vpop.f32.mrb[1].mxu0 }
  0xd9   :  { %v141_v19 = vadd.f32 %v140_v18, %v40_v13 }
  0xda   :  { %v160_v20 = vmax.f32 %v146_v17, 0.0 }
  0xdb   :  { %v159_v22 = vmax.f32 %v141_v19, 0.0  ;;  %v382_v23 = vpop.f32.mrb[2].mxu0 }
  0xdc   :  { %v156_v24 = vadd.f32 %v382_v23, %v55_v21  ;;  %v150_v25 = vpop.f32.mrb[3].mxu0 }
  0xdd   :  { %v151_v26 = vadd.f32 %v150_v25, %v50_v14  ;;  %v401_v27 = vpack.c.bf16 %v160_v20, %v159_v22 }
  0xde   :  { %v162_v28 = vmax.f32 %v156_v24, 0.0 }
  0xdf   :  { %v161_v29 = vmax.f32 %v151_v26, 0.0  ;;  %402 = vmatprep.subr.bf16.mxu1 %v401_v27 }
  0xe0   :  { %404 = vmatpush3.bf16.msra.mxu1 %v401_v27 }
  0xe1   :  { %v405_v30 = vpack.c.bf16 %v162_v28, %v161_v29 }
  0xe3   :  { %406 = vmatprep.subr.bf16.mxu1 %v405_v30 }
  0xe4   :  { %408 = vmatpush3.bf16.msra.mxu1 %v405_v30 }
  0xe7   :  { %392 = vmatmul.mubr.msk.f32.vlgmr.msra.gmra.mrb[0].mxu1 %vm177_vm2, %v164_v31 }
 0x1ba   :  { %v393_v35 = vpop.f32.mrb[0].mxu1 }
 0x1bb   :  { %v256_v37 = vadd.f32 %v393_v35, %v175_v34  ;;  %v250_v38 = vpop.f32.mrb[1].mxu1 }
 0x1bc   :  { %v251_v39 = vadd.f32 %v250_v38, %v170_v36 }
 0x1bd   :  { %v260_v40 = vmax.f32 %v256_v37, 0.0 }
 0x1be   :  { %v259_v41 = vmax.f32 %v251_v39, 0.0 }
 0x1c0   :  { %v410_v42 = vpack.c.bf16 %v260_v40, %v259_v41 }
 0x1c2   :  { %411 = vmatpush3.bf16.msra.mxu0 %v410_v42 }
 0x1c5   :  { %399 = vmatmul.mubr.msk.f32.vlgmr.msra.gmra.mrb[4].mxu0 %vm264_vm4, %v261_v43 }
 0x298   :  { %v334_v45 = vpop.f32.mrb[4].mxu0 }
 0x299   :  { %v335_v46 = vadd.f32 %v334_v45, %v263_v44  ;;  %v400_v47 = vpop.f32.mrb[5].mxu0 }
 0x29b   :  { %338 = vst [vmem:[#allocation3] sm:$0x1] %v335_v46 }
 0x29c   :  { %430 = shalt.err (!%p427_p4)
}
 0x29d   :  { %s431_s8 = scalar_lea.hbm %s558_s7, 16 }
 0x29e   :  { %p432_p5 = scmp.ne.s32.totalorder %s558_s7, %s431_s8  ;;  %p435_p6 = scmp.lt.u32.totalorder %s431_s8, %s558_s7 }
 0x2a0   :  { %p437_p7 = pnand %p435_p6, %p432_p5 }
 0x2a2   :  { %440 = shalt.err (!%p437_p7)
}
 0x2a3   :  { %348 = dma.vmem_to_hbm [thread:$0]  %s346_s27, 16, %s558_s7, [#allocation4]  }
 0x2a4   :  { %441 = dma.done.wait [#allocation4], 16  }
 0x2a5   :  { %442 = vsyncadd [#allocation4], 4294967280 }
 0x2a6   :  { %352 = vsyncpa [#allocation4], 1 }

</bundles_post_ra>
